<compile_context>
chip_gen: v7x
topology: tpu7x:2x2x1
jax: 0.10.0
libtpu: 0.0.40
codegen_flags: <defaults>
</compile_context>

<pallas_src>
import functools
import math

import jax
import jax.numpy as jnp
from jax.experimental import pallas as pl
from jax.experimental.pallas import tpu as pltpu

_INV_SQRT2 = 1.0 / math.sqrt(2.0)
_SQRT_2_OVER_PI = math.sqrt(2.0 / math.pi)
_LN_EPS = 1e-12


def _round_up(x, m):
    return (x + m - 1) // m * m


def _vmem_capacity_bytes():
    try:
        return int(pltpu.get_tpu_info().vmem_capacity_bytes)
    except Exception:
        return 64 * 1024 * 1024  # conservative (v7x-sized) fallback


def _choose_tiles(m, in_dim, hid_dim, out_pad, x_bytes, w_bytes, budget,
                  block_m=None, block_k=None):
    """Pick (tm, tk, nk, k_pad) under a VMEM budget.

    Preference order:
      1. nk == 1 (whole in_dim resident: W1 DMA'd once, no accumulator).
      2. K-tiled with the largest row tile that fits (in_dim padded to tk).
    """
    m8 = _round_up(max(m, 1), 8)
    tm_opts = []
    for t in (block_m, 512, 256, 128, 64, 32, 16, 8):
        if t is None or t % 8:
            continue
        t = min(t, m8)
        if t not in tm_opts:
            tm_opts.append(t)
    tm_opts.sort(reverse=True)

    def usage(tm, tk, multi_k):
        x_buf = 2 * tm * tk * x_bytes                      # double-buffered x
        w1_buf = (2 if multi_k else 1) * tk * hid_dim * w_bytes
        acc = tm * hid_dim * 4 if multi_k else 0           # f32 accumulator
        consts = (3 * hid_dim + out_pad) * 4 + hid_dim * out_pad * w_bytes
        out_buf = 2 * tm * out_pad * 4
        epilogue = 2 * tm * hid_dim * 4                    # GeLU/LN temporaries
        return x_buf + w1_buf + acc + consts + out_buf + epilogue

    # Pass 1: keep the full reduction dim resident (preferred).
    for tm in tm_opts:
        if usage(tm, in_dim, False) <= budget:
            return tm, in_dim, 1, in_dim

    # Pass 2: tile K (padding in_dim up to a tk multiple in the wrapper).
    tk_opts = []
    for t in (block_k, 512, 256, 128):
        if t is None or t % 128:
            continue
        if t < in_dim and t not in tk_opts:
            tk_opts.append(t)
    tk_opts.sort(reverse=True)
    for tm in tm_opts:
        for tk in tk_opts:
            k_pad = _round_up(in_dim, tk)
            if usage(tm, tk, k_pad // tk > 1) <= budget:
                return tm, tk, k_pad // tk, k_pad

    # Fallback for monster shapes: minimal row tile, modest K tile.
    tk = in_dim if in_dim <= 512 else 512
    k_pad = _round_up(in_dim, tk)
    return 8, tk, k_pad // tk, k_pad


def _classifier_kernel(x_ref, w1_ref, b1_ref, g_ref, beta_ref, w2_ref, b2_ref,
                       o_ref, *scratch, approximate_gelu, single_k, precision):
    """grid = (m_tiles, k_tiles); k is the in_dim reduction of the 1st Linear."""

    def epilogue(h):
        # h: (tm, hid) f32 pre-activation, bias already added.
        if approximate_gelu:
            # tanh formulation -> transcendental on the (otherwise idle) EUP slot.
            h = 0.5 * h * (1.0 + jnp.tanh(
                _SQRT_2_OVER_PI * (h + 0.044715 * h * h * h)))
        else:
            # exact erf: matches the PyTorch GeLU module.
            h = h * 0.5 * (1.0 + jax.lax.erf(h * _INV_SQRT2))

        # BertLayerNorm over the hidden dim (eps inside the sqrt).
        u = jnp.mean(h, axis=-1, keepdims=True)
        c = h - u
        s = jnp.mean(c * c, axis=-1, keepdims=True)
        h = g_ref[...] * (c * jax.lax.rsqrt(s + _LN_EPS)) + beta_ref[...]

        # Second Linear: keep W2 in its native dtype (1-pass bf16 MXU path when
        # W2 is bf16); accumulate in f32, cast only on the final store.
        out = jnp.dot(h.astype(w2_ref.dtype), w2_ref[...],
                      preferred_element_type=jnp.float32,
                      precision=precision) + b2_ref[...]
        o_ref[...] = out.astype(o_ref.dtype)

    if single_k:
        # Whole in_dim resident -> no accumulator round-trip through VMEM scratch.
        h = jnp.dot(x_ref[...], w1_ref[...],
                    preferred_element_type=jnp.float32,
                    precision=precision) + b1_ref[...]
        epilogue(h)
    else:
        acc_ref, = scratch
        k = pl.program_id(1)

        @pl.when(k == 0)
        def _():
            acc_ref[...] = jnp.zeros_like(acc_ref)

        acc_ref[...] += jnp.dot(x_ref[...], w1_ref[...],
                                preferred_element_type=jnp.float32,
                                precision=precision)

        @pl.when(k == pl.num_programs(1) - 1)
        def _():
            # TODO(synk): for very large hid_dim, chunk the LN + 2nd matmul over
            # hid lanes (two-pass LN) to cut epilogue (tm, hid) f32 temporaries.
            epilogue(acc_ref[...] + b1_ref[...])


def simple_classifier_forward(x, params, *, block_m=None, block_k=None,
                              approximate_gelu=False, precision=None,
                              vmem_limit_bytes=None):
    """SimpleClassifier forward as a single fused Pallas TPU kernel.

    Weights use the JAX convention: w1 (in_dim, hid_dim), w2 (hid_dim, out_dim),
    i.e. already transposed relative to torch.nn.Linear.weight.
    """
    w1, b1 = params["w1"], params["b1"]
    gamma, beta = params["ln_weight"], params["ln_bias"]
    w2, b2 = params["w2"], params["b2"]

    in_dim, hid_dim = w1.shape
    out_dim = w2.shape[1]
    assert x.shape[-1] == in_dim

    lead_shape = x.shape[:-1]
    x2d = x.reshape(-1, in_dim)
    m = x2d.shape[0]

    # --- lane-dense output: pad out_dim to a 128 multiple (no masked stores).
    out_pad = max(_round_up(out_dim, 128), 128)
    if out_pad != out_dim:
        w2p = jnp.pad(w2, ((0, 0), (0, out_pad - out_dim)))
        b2p = jnp.pad(b2, ((0, out_pad - out_dim),))
    else:
        w2p, b2p = w2, b2

    # --- generation-aware VMEM budget + tile selection.
    if vmem_limit_bytes is None:
        vmem_limit_bytes = int(_vmem_capacity_bytes() * 0.75)
    tm, tk, nk, k_pad = _choose_tiles(
        m, in_dim, hid_dim, out_pad,
        x.dtype.itemsize, w1.dtype.itemsize, vmem_limit_bytes,
        block_m=block_m, block_k=block_k)
    single_k = (nk == 1)

    # --- pad rows (M) to the row tile and the reduction (K) to the K tile.
    m_pad = _round_up(max(m, 1), tm)
    pads_m = m_pad - m
    pads_k = k_pad - in_dim
    if pads_m or pads_k:
        x2d = jnp.pad(x2d, ((0, pads_m), (0, pads_k)))
    w1p = jnp.pad(w1, ((0, pads_k), (0, 0))) if pads_k else w1

    # 1-row f32 views of per-feature vectors (broadcast against (tm, lanes)).
    b1_r = b1.reshape(1, hid_dim).astype(jnp.float32)
    g_r = gamma.reshape(1, hid_dim).astype(jnp.float32)
    beta_r = beta.reshape(1, hid_dim).astype(jnp.float32)
    b2_r = b2p.reshape(1, out_pad).astype(jnp.float32)

    def _const_spec(shape):
        # Constant block index -> single buffer (double-buffering is wasted VMEM).
        idx = lambda i, k: (0, 0)
        try:
            return pl.BlockSpec(shape, idx, pipeline_mode=pl.Buffered(1))
        except TypeError:  # older BlockSpec without pipeline_mode
            return pl.BlockSpec(shape, idx)

    if single_k:
        w1_spec = _const_spec((tk, hid_dim))           # W1 resident, DMA'd once
    else:
        w1_spec = pl.BlockSpec((tk, hid_dim), lambda i, k: (k, 0))

    grid = (m_pad // tm, nk)

    out2d = pl.pallas_call(
        functools.partial(_classifier_kernel,
                          approximate_gelu=approximate_gelu,
                          single_k=single_k,
                          precision=precision),
        out_shape=jax.ShapeDtypeStruct((m_pad, out_pad), x.dtype),
        grid=grid,
        in_specs=[
            pl.BlockSpec((tm, tk), lambda i, k: (i, k)),   # x
            w1_spec,                                       # W1
            _const_spec((1, hid_dim)),                     # b1
            _const_spec((1, hid_dim)),                     # LN weight
            _const_spec((1, hid_dim)),                     # LN bias
            _const_spec((hid_dim, out_pad)),               # W2 (lane-padded)
            _const_spec((1, out_pad)),                     # b2
        ],
        out_specs=pl.BlockSpec((tm, out_pad), lambda i, k: (i, 0)),
        scratch_shapes=([] if single_k
                        else [pltpu.VMEM((tm, hid_dim), jnp.float32)]),
        compiler_params=pltpu.CompilerParams(
            dimension_semantics=("parallel", "arbitrary"),
            vmem_limit_bytes=vmem_limit_bytes,
        ),
    )(x2d, w1p, b1_r, g_r, beta_r, w2p, b2_r)

    out2d = out2d[:m, :out_dim]
    return out2d.reshape(lead_shape + (out_dim,))


def simple_classifier_reference(x, params):
    """Pure-JAX reference mirroring the PyTorch module (exact-erf GeLU)."""
    w1, b1 = params["w1"], params["b1"]
    gamma, beta = params["ln_weight"], params["ln_bias"]
    w2, b2 = params["w2"], params["b2"]
    h = jnp.dot(x, w1) + b1
    h = h * 0.5 * (1.0 + jax.lax.erf(h * _INV_SQRT2))
    u = jnp.mean(h, axis=-1, keepdims=True)
    s = jnp.mean((h - u) ** 2, axis=-1, keepdims=True)
    h = (h - u) / jnp.sqrt(s + _LN_EPS)
    h = gamma * h + beta
    return jnp.dot(h, w2) + b2


if __name__ == "__main__":
    batch, seq, in_dim, hid_dim, out_dim = 2, 8, 128, 128, 16

    key = jax.random.PRNGKey(0)
    kx, kw1, kb1, klw, klb, kw2, kb2 = jax.random.split(key, 7)

    x = jax.random.normal(kx, (batch, seq, in_dim), dtype=jnp.float32)
    params = {
        "w1": jax.random.normal(kw1, (in_dim, hid_dim), jnp.float32)
              * (1.0 / math.sqrt(in_dim)),
        "b1": 0.1 * jax.random.normal(kb1, (hid_dim,), jnp.float32),
        "ln_weight": 1.0 + 0.05 * jax.random.normal(klw, (hid_dim,), jnp.float32),
        "ln_bias": 0.05 * jax.random.normal(klb, (hid_dim,), jnp.float32),
        "w2": jax.random.normal(kw2, (hid_dim, out_dim), jnp.float32)
              * (1.0 / math.sqrt(hid_dim)),
        "b2": 0.1 * jax.random.normal(kb2, (out_dim,), jnp.float32),
    }

    out = simple_classifier_forward(x, params)
    out = jax.block_until_ready(out)

    ref = simple_classifier_reference(x, params)
    assert out.shape == ref.shape and out.dtype == ref.dtype
    max_err = jnp.max(jnp.abs(out - ref))
    # DEFAULT-precision (bf16 MXU) matmuls in both kernel and reference.
    assert jnp.allclose(out, ref, atol=2e-2, rtol=2e-2), (
        f"mismatch vs reference: max abs err {max_err:.3e}")

    print("KERNEL_OK")
</pallas_src>

<mosaic_0001>
module attributes {stable_mosaic.version = 11 : i64} {
  func.func @_classifier_kernel(%arg0: i32, %arg1: i32, %arg2: memref<16x128xf32, #tpu.memory_space<vmem>>, %arg3: memref<128x128xf32, #tpu.memory_space<vmem>>, %arg4: memref<1x128xf32, #tpu.memory_space<vmem>>, %arg5: memref<1x128xf32, #tpu.memory_space<vmem>>, %arg6: memref<1x128xf32, #tpu.memory_space<vmem>>, %arg7: memref<128x128xf32, #tpu.memory_space<vmem>>, %arg8: memref<1x128xf32, #tpu.memory_space<vmem>>, %arg9: memref<16x128xf32, #tpu.memory_space<vmem>>) attributes {dimension_semantics = [#tpu.dimension_semantics<parallel>, #tpu.dimension_semantics<arbitrary>], iteration_bounds = array<i64: 1, 1>, scalar_prefetch = 0 : i64, scratch_operands = 0 : i64, tpu.core_type = #tpu.core_type<tc>, window_params = [{transform_indices = @transform_0, window_bounds = array<i64: 16, 128>}, {pipeline_mode = #tpu.pipeline_mode<synchronous>, transform_indices = @transform_1, window_bounds = array<i64: 128, 128>}, {pipeline_mode = #tpu.pipeline_mode<synchronous>, transform_indices = @transform_2, window_bounds = array<i64: 1, 128>}, {pipeline_mode = #tpu.pipeline_mode<synchronous>, transform_indices = @transform_3, window_bounds = array<i64: 1, 128>}, {pipeline_mode = #tpu.pipeline_mode<synchronous>, transform_indices = @transform_4, window_bounds = array<i64: 1, 128>}, {pipeline_mode = #tpu.pipeline_mode<synchronous>, transform_indices = @transform_5, window_bounds = array<i64: 128, 128>}, {pipeline_mode = #tpu.pipeline_mode<synchronous>, transform_indices = @transform_6, window_bounds = array<i64: 1, 128>}, {transform_indices = @transform_7, window_bounds = array<i64: 16, 128>}]} {
    %c0 = arith.constant 0 : index
    %c0_0 = arith.constant 0 : index
    %0 = vector.load %arg2[%c0, %c0_0] : memref<16x128xf32, #tpu.memory_space<vmem>>, vector<16x128xf32>
    %c0_1 = arith.constant 0 : index
    %c0_2 = arith.constant 0 : index
    %1 = vector.load %arg3[%c0_1, %c0_2] : memref<128x128xf32, #tpu.memory_space<vmem>>, vector<128x128xf32>
    %cst = arith.constant dense<0.000000e+00> : vector<16x128xf32>
    %2 = tpu.matmul %0, %1, %cst {dimension_numbers = #tpu.dot_dimension_numbers<[1], [0], [0], [1], [0, 0, 1, 1], [], []>} : vector<16x128xf32>, vector<128x128xf32>, vector<16x128xf32> -> vector<16x128xf32>
    %c0_3 = arith.constant 0 : index
    %c0_4 = arith.constant 0 : index
    %3 = vector.load %arg4[%c0_3, %c0_4] : memref<1x128xf32, #tpu.memory_space<vmem>>, vector<1x128xf32>
    %4 = vector.broadcast %3 : vector<1x128xf32> to vector<16x128xf32>
    %5 = arith.addf %2, %4 : vector<16x128xf32>
    %cst_5 = arith.constant 5.000000e-01 : f32
    %6 = vector.broadcast %cst_5 : f32 to vector<16x128xf32>
    %7 = arith.mulf %5, %6 : vector<16x128xf32>
    %cst_6 = arith.constant 0.707106769 : f32
    %8 = vector.broadcast %cst_6 : f32 to vector<16x128xf32>
    %9 = arith.mulf %5, %8 : vector<16x128xf32>
    %10 = math.erf %9 : vector<16x128xf32>
    %cst_7 = arith.constant 1.000000e+00 : f32
    %11 = vector.broadcast %cst_7 : f32 to vector<16x128xf32>
    %12 = arith.addf %11, %10 : vector<16x128xf32>
    %13 = arith.mulf %7, %12 : vector<16x128xf32>
    %cst_8 = arith.constant dense<0.000000e+00> : vector<16xf32>
    %14 = vector.multi_reduction <add>, %13, %cst_8 [1] : vector<16x128xf32> to vector<16xf32>
    %15 = vector.shape_cast %14 : vector<16xf32> to vector<16x1xf32>
    %cst_9 = arith.constant 1.280000e+02 : f32
    %16 = vector.broadcast %cst_9 : f32 to vector<16x1xf32>
    %17 = arith.divf %15, %16 : vector<16x1xf32>
    %18 = vector.broadcast %17 : vector<16x1xf32> to vector<16x128xf32>
    %19 = arith.subf %13, %18 : vector<16x128xf32>
    %20 = arith.mulf %19, %19 : vector<16x128xf32>
    %cst_10 = arith.constant dense<0.000000e+00> : vector<16xf32>
    %21 = vector.multi_reduction <add>, %20, %cst_10 [1] : vector<16x128xf32> to vector<16xf32>
    %22 = vector.shape_cast %21 : vector<16xf32> to vector<16x1xf32>
    %cst_11 = arith.constant 1.280000e+02 : f32
    %23 = vector.broadcast %cst_11 : f32 to vector<16x1xf32>
    %24 = arith.divf %22, %23 : vector<16x1xf32>
    %c0_12 = arith.constant 0 : index
    %c0_13 = arith.constant 0 : index
    %25 = vector.load %arg5[%c0_12, %c0_13] : memref<1x128xf32, #tpu.memory_space<vmem>>, vector<1x128xf32>
    %cst_14 = arith.constant 9.99999996E-13 : f32
    %26 = vector.broadcast %cst_14 : f32 to vector<16x1xf32>
    %27 = arith.addf %24, %26 : vector<16x1xf32>
    %28 = math.rsqrt %27 : vector<16x1xf32>
    %29 = vector.broadcast %28 : vector<16x1xf32> to vector<16x128xf32>
    %30 = arith.mulf %19, %29 : vector<16x128xf32>
    %31 = vector.broadcast %25 : vector<1x128xf32> to vector<16x128xf32>
    %32 = arith.mulf %31, %30 : vector<16x128xf32>
    %c0_15 = arith.constant 0 : index
    %c0_16 = arith.constant 0 : index
    %33 = vector.load %arg6[%c0_15, %c0_16] : memref<1x128xf32, #tpu.memory_space<vmem>>, vector<1x128xf32>
    %34 = vector.broadcast %33 : vector<1x128xf32> to vector<16x128xf32>
    %35 = arith.addf %32, %34 : vector<16x128xf32>
    %c0_17 = arith.constant 0 : index
    %c0_18 = arith.constant 0 : index
    %36 = vector.load %arg7[%c0_17, %c0_18] : memref<128x128xf32, #tpu.memory_space<vmem>>, vector<128x128xf32>
    %cst_19 = arith.constant dense<0.000000e+00> : vector<16x128xf32>
    %37 = tpu.matmul %35, %36, %cst_19 {dimension_numbers = #tpu.dot_dimension_numbers<[1], [0], [0], [1], [0, 0, 1, 1], [], []>} : vector<16x128xf32>, vector<128x128xf32>, vector<16x128xf32> -> vector<16x128xf32>
    %c0_20 = arith.constant 0 : index
    %c0_21 = arith.constant 0 : index
    %38 = vector.load %arg8[%c0_20, %c0_21] : memref<1x128xf32, #tpu.memory_space<vmem>>, vector<1x128xf32>
    %39 = vector.broadcast %38 : vector<1x128xf32> to vector<16x128xf32>
    %40 = arith.addf %37, %39 : vector<16x128xf32>
    %c0_22 = arith.constant 0 : index
    %c0_23 = arith.constant 0 : index
    %41 = vector.load %arg9[%c0_22, %c0_23] : memref<16x128xf32, #tpu.memory_space<vmem>>, vector<16x128xf32>
    tpu.vector_store %arg9[%c0_22, %c0_23], %40 {strides = array<i32>} : memref<16x128xf32, #tpu.memory_space<vmem>>, vector<16x128xf32>,
    return
  }
  func.func @transform_0(%arg0: i32, %arg1: i32) -> (i32, i32) {
    %c0_i32 = arith.constant 0 : i32
    return %arg0, %arg1 : i32, i32
  }
  func.func @transform_1(%arg0: i32, %arg1: i32) -> (i32, i32) {
    %c0_i32 = arith.constant 0 : i32
    %c0_i32_0 = arith.constant 0 : i32
    %c0_i32_1 = arith.constant 0 : i32
    return %c0_i32, %c0_i32_0 : i32, i32
  }
  func.func @transform_2(%arg0: i32, %arg1: i32) -> (i32, i32) {
    %c0_i32 = arith.constant 0 : i32
    %c0_i32_0 = arith.constant 0 : i32
    %c0_i32_1 = arith.constant 0 : i32
    return %c0_i32, %c0_i32_0 : i32, i32
  }
  func.func @transform_3(%arg0: i32, %arg1: i32) -> (i32, i32) {
    %c0_i32 = arith.constant 0 : i32
    %c0_i32_0 = arith.constant 0 : i32
    %c0_i32_1 = arith.constant 0 : i32
    return %c0_i32, %c0_i32_0 : i32, i32
  }
  func.func @transform_4(%arg0: i32, %arg1: i32) -> (i32, i32) {
    %c0_i32 = arith.constant 0 : i32
    %c0_i32_0 = arith.constant 0 : i32
    %c0_i32_1 = arith.constant 0 : i32
    return %c0_i32, %c0_i32_0 : i32, i32
  }
  func.func @transform_5(%arg0: i32, %arg1: i32) -> (i32, i32) {
    %c0_i32 = arith.constant 0 : i32
    %c0_i32_0 = arith.constant 0 : i32
    %c0_i32_1 = arith.constant 0 : i32
    return %c0_i32, %c0_i32_0 : i32, i32
  }
  func.func @transform_6(%arg0: i32, %arg1: i32) -> (i32, i32) {
    %c0_i32 = arith.constant 0 : i32
    %c0_i32_0 = arith.constant 0 : i32
    %c0_i32_1 = arith.constant 0 : i32
    return %c0_i32, %c0_i32_0 : i32, i32
  }
  func.func @transform_7(%arg0: i32, %arg1: i32) -> (i32, i32) {
    %c0_i32 = arith.constant 0 : i32
    %c0_i32_0 = arith.constant 0 : i32
    return %arg0, %c0_i32 : i32, i32
  }
}

</mosaic_0001>

<bundles_post_ra>
// kernel: tpu_custom_call.1
= control target key start
LH: loop header
LB: loop body
LE: loop exit
PB: predicated region body
PF: predicated region fallthrough
CT: control target
= control target key end

     0   :  { %12 = vsyncpa [#allocation3], 0  ;;  %s744_s0 = inlined_call_operand.hbm [shape: f32[16,128], index: 0, kind: input, shape index: {}]   ;;  %s745_s1 = inlined_call_operand.hbm [shape: f32[128,128], index: 1, kind: input, shape index: {}]   ;;  %s746_s2 = inlined_call_operand.vmem [shape: f32[1,128], index: 2, kind: input, shape index: {}]   ;;  %s747_s3 = inlined_call_operand.vmem [shape: f32[1,128], index: 3, kind: input, shape index: {}]   ;;  %s748_s4 = inlined_call_operand.vmem [shape: f32[1,128], index: 4, kind: input, shape index: {}]   ;;  %s749_s5 = inlined_call_operand.hbm [shape: f32[128,128], index: 5, kind: input, shape index: {}]   ;;  %s750_s6 = inlined_call_operand.vmem [shape: f32[1,128], index: 6, kind: input, shape index: {}]   ;;  %s751_s7 = inlined_call_operand.hbm [shape: f32[16,128], index: 7, kind: output, shape index: {}]  }
   0x1   :  { %13 = vsyncpa [#allocation6], 0 }
   0x2   :  { %14 = vsyncpa [#allocation4], 0  ;;  %s619_s24 = smov [#allocation5]   ;;  %s620_s26 = smov [#allocation2]  }
   0x3   :  { %s32_s25 = sshll.u32 %s619_s24, 4  ;;  %s20_s27 = sshll.u32 %s620_s26, 4  ;;  %s33_s25 = int_to_ptr.vmem [resolvable:$true] %s32_s25  ;;  %s665_s27 = int_to_ptr.vmem [resolvable:$true] %s20_s27 }
   0x4   :  { %s525_s30 = scalar_lea.hbm %s745_s1, 2048 }
   0x5   :  { %p526_p0 = scmp.ne.s32.totalorder %s745_s1, %s525_s30  ;;  %p529_p1 = scmp.lt.u32.totalorder %s525_s30, %s745_s1 }
   0x7   :  { %p531_p2 = pnand %p529_p1, %p526_p0 }
   0x9   :  { %534 = shalt.err (!%p531_p2)
}
   0xa   :  { %s535_s12 = scalar_lea.vmem %s33_s25, 2048  ;;  %p540_p4 = scmp.lt.s32.totalorder %s33_s25, %s33_s25 }
   0xb   :  { %p536_p3 = scmp.ne.s32.totalorder %s33_s25, %s535_s12  ;;  %p541_p5 = scmp.lt.s32.totalorder %s535_s12, %s535_s12 }
   0xd   :  { %p542_p6 = por %p541_p5, %p540_p4 }
   0xf   :  { %p543_p7 = pnand %p542_p6, %p536_p3 }
  0x11   :  { %546 = shalt.err (!%p543_p7)
}
  0x12   :  { %s621_s13 = smov 128   ;;  %s622_s14 = smov 8  }
  0x13   :  { %38 = dma.hbm_to_vmem [thread:$0]  %s745_s1, 2048, %s33_s25, [#allocation6], %s621_s13, %s621_s13, %s622_s14  }
  0x14   :  { %s547_s19 = scalar_lea.hbm %s744_s0, 256 }
  0x15   :  { %p548_p8 = scmp.ne.s32.totalorder %s744_s0, %s547_s19  ;;  %p551_p9 = scmp.lt.u32.totalorder %s547_s19, %s744_s0 }
  0x17   :  { %p553_p10 = pnand %p551_p9, %p548_p8 }
  0x19   :  { %556 = shalt.err (!%p553_p10)
}
  0x1a   :  { %s557_s24 = scalar_lea.vmem %s665_s27, 256  ;;  %p562_p12 = scmp.lt.s32.totalorder %s665_s27, %s665_s27 }
  0x1b   :  { %p558_p11 = scmp.ne.s32.totalorder %s665_s27, %s557_s24  ;;  %p563_p13 = scmp.lt.s32.totalorder %s557_s24, %s557_s24 }
  0x1d   :  { %p564_p0 = por %p563_p13, %p562_p12 }
  0x1f   :  { %p565_p1 = pnand %p564_p0, %p558_p11 }
  0x21   :  { %568 = shalt.err (!%p565_p1)
}
  0x22   :  { %26 = dma.hbm_to_vmem [thread:$0]  %s744_s0, 256, %s665_s27, [#allocation3], %s621_s13, %s621_s13, %s622_s14  }
  0x23   :  { %s623_s26 = smov [#allocation7]   ;;  %s569_s8 = scalar_lea.hbm %s749_s5, 2048 }
  0x24   :  { %s50_s28 = sshll.u32 %s623_s26, 4  ;;  %p570_p2 = scmp.ne.s32.totalorder %s749_s5, %s569_s8  ;;  %s51_s28 = int_to_ptr.vmem [resolvable:$true] %s50_s28 }
  0x25   :  { %p573_p3 = scmp.lt.u32.totalorder %s569_s8, %s749_s5 }
  0x27   :  { %p575_p4 = pnand %p573_p3, %p570_p2 }
  0x29   :  { %578 = shalt.err (!%p575_p4)
}
  0x2a   :  { %s579_s15 = scalar_lea.vmem %s51_s28, 2048  ;;  %p584_p6 = scmp.lt.s32.totalorder %s51_s28, %s51_s28 }
  0x2b   :  { %p580_p5 = scmp.ne.s32.totalorder %s51_s28, %s579_s15  ;;  %p585_p7 = scmp.lt.s32.totalorder %s579_s15, %s579_s15 }
  0x2d   :  { %p586_p8 = por %p585_p7, %p584_p6 }
  0x2f   :  { %p587_p9 = pnand %p586_p8, %p580_p5 }
  0x31   :  { %590 = shalt.err (!%p587_p9)
}
  0x32   :  { %56 = dma.hbm_to_vmem [thread:$0]  %s749_s5, 2048, %s51_s28, [#allocation6], %s621_s13, %s621_s13, %s622_s14  }
  0x33   :  { %613 = dma.done.wait [#allocation3], 256  }
  0x34   :  { %614 = vsyncadd [#allocation3], 4294967040 }
  0x35   :  { %615 = dma.done.wait [#allocation6], 4096  }
  0x36   :  { %616 = vsyncadd [#allocation6], 4294963200  ;;  %v70_v0 = vld [vmem:[#allocation5] sm:$0xff]  ;;  %v71_v1 = vld [vmem:[#allocation5 + $0x8] sm:$0xff]  ;;  %s624_s22 = smov [#allocation8]  }
  0x37   :  { %v72_v2 = vld [vmem:[#allocation5 + $0x10] sm:$0xff]  ;;  %v447_v3 = vpack.c.bf16 %v71_v1, %v70_v0  ;;  %v73_v4 = vld [vmem:[#allocation5 + $0x18] sm:$0xff]  ;;  %v74_v6 = vld [vmem:[#allocation5 + $0x20] sm:$0xff]  ;;  %s324_s23 = sshll.u32 %s624_s22, 4  ;;  %s325_s23 = int_to_ptr.vmem [resolvable:$true] %s324_s23 }
  0x38   :  { %v451_v5 = vpack.c.bf16 %v73_v4, %v72_v2  ;;  %v75_v7 = vld [vmem:[#allocation5 + $0x28] sm:$0xff]  ;;  %v68_v9 = vld [vmem:[#allocation2] sm:$0xff]  ;;  %v77_v11 = vld [vmem:[#allocation5 + $0x38] sm:$0xff]  ;;  %p596_p11 = scmp.lt.s32.totalorder %s325_s23, %s325_s23 }
  0x39   :  { %448 = vmatprep.subr.bf16.mxu0 %v447_v3  ;;  %v455_v8 = vpack.c.bf16 %v75_v7, %v74_v6  ;;  %v76_v10 = vld [vmem:[#allocation5 + $0x30] sm:$0xff]  ;;  %409 = vmatprep.mubr.f32.mxu0 %v68_v9  ;;  %v78_v13 = vld [vmem:[#allocation5 + $0x40] sm:$0xff]  ;;  %v79_v14 = vld [vmem:[#allocation5 + $0x48] sm:$0xff] }
  0x3a   :  { %450 = vmatpush3.bf16.msra.mxu0 %v447_v3  ;;  %v459_v12 = vpack.c.bf16 %v77_v11, %v76_v10  ;;  %v463_v15 = vpack.c.bf16 %v79_v14, %v78_v13  ;;  %v80_v16 = vld [vmem:[#allocation5 + $0x50] sm:$0xff]  ;;  %v81_v17 = vld [vmem:[#allocation5 + $0x58] sm:$0xff]  ;;  %v82_v19 = vld [vmem:[#allocation5 + $0x60] sm:$0xff] }
  0x3b   :  { %452 = vmatprep.subr.bf16.mxu0 %v451_v5  ;;  %v467_v18 = vpack.c.bf16 %v81_v17, %v80_v16  ;;  %v83_v20 = vld [vmem:[#allocation5 + $0x68] sm:$0xff]  ;;  %v84_v22 = vld [vmem:[#allocation5 + $0x70] sm:$0xff]  ;;  %v85_v23 = vld [vmem:[#allocation5 + $0x78] sm:$0xff] }
  0x3c   :  { %v471_v21 = vpack.c.bf16 %v83_v20, %v82_v19  ;;  %v475_v24 = vpack.c.bf16 %v85_v23, %v84_v22  ;;  %v69_v25 = vld [vmem:[#allocation2 + $0x8] sm:$0xff]  ;;  %v337_v26 = vld [vmem:[%s746_s2] ss:$0 sm:$0xff]  ;;  %v219_v41 = vld [vmem:[#allocation7] sm:$0xff] }
  0x3d   :  { %v220_v42 = vld [vmem:[#allocation7 + $0x8] sm:$0xff]  ;;  %v221_v43 = vld [vmem:[#allocation7 + $0x10] sm:$0xff]  ;;  %v222_v45 = vld [vmem:[#allocation7 + $0x18] sm:$0xff] }
  0x3e   :  { %454 = vmatpush3.bf16.msra.mxu0 %v451_v5  ;;  %v479_v44 = vpack.c.bf16 %v220_v42, %v219_v41  ;;  %v483_v46 = vpack.c.bf16 %v222_v45, %v221_v43  ;;  %v223_v55 = vld [vmem:[#allocation7 + $0x20] sm:$0xff]  ;;  %v224_v56 = vld [vmem:[#allocation7 + $0x28] sm:$0xff]  ;;  %v225_v58 = vld [vmem:[#allocation7 + $0x30] sm:$0xff] }
  0x3f   :  { %456 = vmatprep.subr.bf16.mxu0 %v455_v8  ;;  %v487_v57 = vpack.c.bf16 %v224_v56, %v223_v55  ;;  %v226_v59 = vld [vmem:[#allocation7 + $0x38] sm:$0xff]  ;;  %v227_v61 = vld [vmem:[#allocation7 + $0x40] sm:$0xff]  ;;  %v228_v62 = vld [vmem:[#allocation7 + $0x48] sm:$0xff] }
  0x40   :  { %480 = vmatprep.subr.bf16.mxu1 %v479_v44  ;;  %v491_v60 = vpack.c.bf16 %v226_v59, %v225_v58  ;;  %v495_v63 = vpack.c.bf16 %v228_v62, %v227_v61  ;;  %v229_v0 = vld [vmem:[#allocation7 + $0x50] sm:$0xff]  ;;  %v230_v1 = vld [vmem:[#allocation7 + $0x58] sm:$0xff]  ;;  %v231_v2 = vld [vmem:[#allocation7 + $0x60] sm:$0xff] }
  0x41   :  { %482 = vmatpush3.bf16.msra.mxu1 %v479_v44  ;;  %v499_v3 = vpack.c.bf16 %v230_v1, %v229_v0  ;;  %v232_v4 = vld [vmem:[#allocation7 + $0x68] sm:$0xff]  ;;  %v233_v6 = vld [vmem:[#allocation7 + $0x70] sm:$0xff]  ;;  %v234_v7 = vld [vmem:[#allocation7 + $0x78] sm:$0xff] }
  0x42   :  { %458 = vmatpush3.bf16.msra.mxu0 %v455_v8  ;;  %484 = vmatprep.subr.bf16.mxu1 %v483_v46  ;;  %v503_v5 = vpack.c.bf16 %v232_v4, %v231_v2  ;;  %v507_v8 = vpack.c.bf16 %v234_v7, %v233_v6  ;;  %v338_v16 = vld [vmem:[%s747_s3] ss:$0 sm:$0xff]  ;;  %s591_s3 = scalar_lea.vmem %s325_s23, 256 }
  0x43   :  { %460 = vmatprep.subr.bf16.mxu0 %v459_v12  ;;  %p592_p10 = scmp.ne.s32.totalorder %s325_s23, %s591_s3  ;;  %p597_p12 = scmp.lt.s32.totalorder %s591_s3, %s591_s3 }
  0x45   :  { %486 = vmatpush3.bf16.msra.mxu1 %v483_v46  ;;  %p598_p13 = por %p597_p12, %p596_p11 }
  0x46   :  { %462 = vmatpush3.bf16.msra.mxu0 %v459_v12  ;;  %488 = vmatprep.subr.bf16.mxu1 %v487_v57 }
  0x47   :  { %464 = vmatprep.subr.bf16.mxu0 %v463_v15  ;;  %p599_p0 = pnand %p598_p13, %p592_p10 }
  0x49   :  { %490 = vmatpush3.bf16.msra.mxu1 %v487_v57 }
  0x4a   :  { %466 = vmatpush3.bf16.msra.mxu0 %v463_v15  ;;  %492 = vmatprep.subr.bf16.mxu1 %v491_v60 }
  0x4b   :  { %468 = vmatprep.subr.bf16.mxu0 %v467_v18 }
  0x4d   :  { %494 = vmatpush3.bf16.msra.mxu1 %v491_v60 }
  0x4e   :  { %470 = vmatpush3.bf16.msra.mxu0 %v467_v18  ;;  %496 = vmatprep.subr.bf16.mxu1 %v495_v63  ;;  %v339_v18 = vld [vmem:[%s748_s4] ss:$0 sm:$0xff] }
  0x4f   :  { %472 = vmatprep.subr.bf16.mxu0 %v471_v21 }
  0x51   :  { %498 = vmatpush3.bf16.msra.mxu1 %v495_v63 }
  0x52   :  { %474 = vmatpush3.bf16.msra.mxu0 %v471_v21  ;;  %500 = vmatprep.subr.bf16.mxu1 %v499_v3 }
  0x53   :  { %476 = vmatprep.subr.bf16.mxu0 %v475_v24 }
  0x55   :  { %502 = vmatpush3.bf16.msra.mxu1 %v499_v3 }
  0x56   :  { %478 = vmatpush3.bf16.msra.mxu0 %v475_v24  ;;  %504 = vmatprep.subr.bf16.mxu1 %v503_v5 }
  0x59   :  { %410 = vmatmul.mubr.f32.vlgmr.msra.gmra.mrb[0].mxu0 %v69_v25  ;;  %506 = vmatpush3.bf16.msra.mxu1 %v503_v5  ;;  %v340_v25 = vld [vmem:[%s750_s6] ss:$0 sm:$0xff] }
  0x5a   :  { %508 = vmatprep.subr.bf16.mxu1 %v507_v8 }
  0x5d   :  { %510 = vmatpush3.bf16.msra.mxu1 %v507_v8 }
 0x12c   :  { %v411_v27 = vpop.f32.mrb[0].mxu0 }
 0x12d   :  { %v165_v28 = vadd.f32 %v411_v27, %v337_v26  ;;  %v159_v29 = vpop.f32.mrb[1].mxu0 }
 0x12e   :  { %v160_v30 = vadd.f32 %v337_v26, %v159_v29 }
 0x12f   :  { %v171_v31 = vmul.f32 0.70710677, %v165_v28  ;;  %v169_v39 = vmul.f32 0.5, %v165_v28 }
 0x130   :  { %v170_v32 = vmul.f32 0.70710677, %v160_v30  ;;  %v168_v35 = vmul.f32 0.5, %v160_v30 }
 0x131   :  { %517 = verf.f32 %v171_v31 }
 0x132   :  { %519 = verf.f32 %v170_v32 }
 0x13b   :  { %v518_v33 = vpop.eup %517 }
 0x13c   :  { %v520_v34 = vpop.eup %519  ;;  %v175_v38 = vadd.f32 1.0, %v518_v33 }
 0x13d   :  { %v174_v36 = vadd.f32 1.0, %v520_v34 }
 0x13e   :  { %v177_v40 = vmul.f32 %v175_v38, %v169_v39 }
 0x13f   :  { %v176_v37 = vmul.f32 %v174_v36, %v168_v35 }
 0x141   :  { %178 = vadd.xlane.f32.xlu0 %v176_v37 }
 0x145   :  { %180 = vadd.xlane.f32.xlu0 %v177_v40 }
 0x1ce   :  { %v179_v47 = vpop.xlane.xlu0 %178 }
 0x1cf   :  { %v183_v48 = vmul.f32 0.0078125, %v179_v47 }
 0x1d1   :  { %v185_v49 = vsub.f32 %v176_v37, %v183_v48 }
 0x1d2   :  { %v181_v50 = vpop.xlane.xlu0 %180 }
 0x1d3   :  { %v184_v51 = vmul.f32 0.0078125, %v181_v50  ;;  %v187_v52 = vmul.f32 %v185_v49, %v185_v49 }
 0x1d5   :  { %v186_v53 = vsub.f32 %v177_v40, %v184_v51  ;;  %189 = vadd.xlane.f32.xlu1 %v187_v52 }
 0x1d7   :  { %v188_v54 = vmul.f32 %v186_v53, %v186_v53 }
 0x1d9   :  { %191 = vadd.xlane.f32.xlu1 %v188_v54 }
 0x262   :  { %v190_v9 = vpop.xlane.xlu1 %189 }
 0x263   :  { %v193_v10 = vmul.f32 0.0078125, %v190_v9 }
 0x265   :  { %v196_v11 = vadd.f32 1e-12, %v193_v10 }
 0x266   :  { %v192_v12 = vpop.xlane.xlu1 %191 }
 0x267   :  { %521 = vrsqrt.f32 %v196_v11  ;;  %v194_v13 = vmul.f32 0.0078125, %v192_v12 }
 0x269   :  { %v197_v14 = vadd.f32 1e-12, %v194_v13 }
 0x26b   :  { %523 = vrsqrt.f32 %v197_v14 }
 0x271   :  { %v522_v15 = vpop.eup %521 }
 0x272   :  { %v200_v17 = vmul.f32 %v522_v15, %v185_v49 }
 0x274   :  { %v208_v19 = vmul.f32 %v338_v16, %v200_v17 }
 0x275   :  { %v524_v20 = vpop.eup %523 }
 0x276   :  { %v201_v21 = vmul.f32 %v524_v20, %v186_v53  ;;  %v217_v22 = vadd.f32 %v339_v18, %v208_v19 }
 0x278   :  { %v209_v23 = vmul.f32 %v338_v16, %v201_v21  ;;  %444 = vmatprep.mubr.f32.mxu1 %v217_v22 }
 0x27a   :  { %v218_v24 = vadd.f32 %v339_v18, %v209_v23 }
 0x27c   :  { %445 = vmatmul.mubr.f32.vlgmr.msra.gmra.mrb[0].mxu1 %v218_v24 }
 0x34f   :  { %v446_v26 = vpop.f32.mrb[0].mxu1 }
 0x350   :  { %v314_v27 = vadd.f32 %v446_v26, %v340_v25  ;;  %v308_v28 = vpop.f32.mrb[1].mxu1 }
 0x351   :  { %v309_v29 = vadd.f32 %v340_v25, %v308_v28 }
 0x352   :  { %318 = vst [vmem:[#allocation8 + $0x8] sm:$0xff] %v314_v27 }
 0x353   :  { %317 = vst [vmem:[#allocation8] sm:$0xff] %v309_v29 }
 0x354   :  { %602 = shalt.err (!%p599_p0)
}
 0x355   :  { %s603_s6 = scalar_lea.hbm %s751_s7, 256 }
 0x356   :  { %p604_p1 = scmp.ne.s32.totalorder %s751_s7, %s603_s6  ;;  %p607_p2 = scmp.lt.u32.totalorder %s603_s6, %s751_s7 }
 0x358   :  { %p609_p3 = pnand %p607_p2, %p604_p1 }
 0x35a   :  { %612 = shalt.err (!%p609_p3)
}
 0x35b   :  { %330 = dma.vmem_to_hbm [thread:$0]  %s325_s23, 256, %s751_s7, [#allocation4], %s621_s13, %s621_s13, %s622_s14  }
 0x35c   :  { %617 = dma.done.wait [#allocation4], 256  }
 0x35d   :  { %618 = vsyncadd [#allocation4], 4294967040 }
 0x35e   :  { %334 = vsyncpa [#allocation3], 1 }
 0x35f   :  { %335 = vsyncpa [#allocation6], 1 }
 0x360   :  { %336 = vsyncpa [#allocation4], 1 }

</bundles_post_ra>
